<compile_context>
chip_gen: v5e
topology: v5e:2x2
jax: 0.10.0
libtpu: 0.0.40
codegen_flags: <defaults>
</compile_context>

<pallas_src>
import functools

import jax
import jax.numpy as jnp
from jax.experimental import pallas as pl
from jax.experimental.pallas import tpu as pltpu


def _double_conv_kernel(x_ref, w1_ref, b1_ref, w2_ref, b2_ref, o_ref,
                        xpad_ref, hpad_ref, *, B, H):
    """One grid step = B batch elements folded into the matmul M dimension.

    x_ref:  (B*H, W*Cin)        f32   lane-packed input (channels in lanes)
    w1_ref: (3*W*Cin, W*Cout)   bf16  merged-tap banded layer-1 weights (BN folded)
    b1_ref: (1, W*Cout)         f32   folded conv-bias + BN bias, tiled over W
    w2_ref: (3*W*Cout, W*Cout)  bf16  merged-tap banded layer-2 weights
    b2_ref: (1, W*Cout)         f32
    o_ref:  (B*H, W*Cout)       f32   lane-dense output (W*Cout = 128 lanes)
    xpad_ref: (B*(H+2), W*Cin)  f32 VMEM  per-batch H-halo padded layer-1 input
    hpad_ref: (B*(H+2), W*Cout) f32 VMEM  per-batch H-halo padded layer-1 output
    """
    wc_in = x_ref.shape[-1]
    wc_out = o_ref.shape[-1]
    Hp = H + 2

    # ---- layer 1: fill halo-padded input; zero ONLY the 2 halo rows per batch ----
    for n in range(B):                                   # static, B is tiny
        r0 = n * Hp
        xpad_ref[pl.ds(r0, 1), :] = jnp.zeros((1, wc_in), jnp.float32)
        xpad_ref[pl.ds(r0 + H + 1, 1), :] = jnp.zeros((1, wc_in), jnp.float32)
        xpad_ref[pl.ds(r0 + 1, H), :] = x_ref[pl.ds(n * H, H), :]

    def banded_conv(pad_ref, w_ref, b_ref):
        # Merged-K banded conv: one (B*H, 3*K) @ (3*K, W*Cout) MXU matmul.
        # Slab = lane-concatenation of the three H-shifted halo-padded views.
        slab = jnp.concatenate(
            [jnp.concatenate(
                [pad_ref[pl.ds(n * Hp + kh, H), :] for n in range(B)], axis=0)
             for kh in range(3)],
            axis=-1).astype(jnp.bfloat16)                 # bf16 MXU operand
        acc = jnp.dot(slab, w_ref[...], preferred_element_type=jnp.float32)
        return jnp.maximum(acc + b_ref[...], 0.0)         # f32 bias + ReLU epilogue

    y1 = banded_conv(xpad_ref, w1_ref, b1_ref)            # (B*H, W*Cout), stays on-chip

    # ---- layer 2: intermediate never touches HBM ----
    for n in range(B):
        r0 = n * Hp
        hpad_ref[pl.ds(r0, 1), :] = jnp.zeros((1, wc_out), jnp.float32)
        hpad_ref[pl.ds(r0 + H + 1, 1), :] = jnp.zeros((1, wc_out), jnp.float32)
        hpad_ref[pl.ds(r0 + 1, H), :] = y1[n * H:(n + 1) * H, :]

    o_ref[...] = banded_conv(hpad_ref, w2_ref, b2_ref).astype(o_ref.dtype)


def _double_conv_pallas(x_packed, w1m, b1p, w2m, b2p, *,
                        N, H, W, cin, cout, num_groups):
    wc_in, wc_out = W * cin, W * cout
    B = N // num_groups                    # batch elements folded into M per step
    M = B * H
    # FLOPs the kernel actually issues on the MXU (banded matmuls), not the
    # smaller logical conv FLOPs.
    flops = 2 * N * H * (3 * wc_in * wc_out + 3 * wc_out * wc_out)
    bytes_accessed = (4 * N * H * wc_in                   # input (f32)
                      + 2 * 3 * wc_in * wc_out            # w1 (bf16)
                      + 2 * 3 * wc_out * wc_out           # w2 (bf16)
                      + 4 * 2 * wc_out                    # biases (f32)
                      + 4 * N * H * wc_out)               # output (f32)
    return pl.pallas_call(
        functools.partial(_double_conv_kernel, B=B, H=H),
        out_shape=jax.ShapeDtypeStruct((N * H, wc_out), jnp.float32),
        grid_spec=pltpu.PrefetchScalarGridSpec(
            num_scalar_prefetch=0,
            grid=(num_groups,),
            in_specs=[
                pl.BlockSpec((M, wc_in), lambda g: (g, 0)),
                pl.BlockSpec((3 * wc_in, wc_out), lambda g: (0, 0)),
                pl.BlockSpec((1, wc_out), lambda g: (0, 0)),
                pl.BlockSpec((3 * wc_out, wc_out), lambda g: (0, 0)),
                pl.BlockSpec((1, wc_out), lambda g: (0, 0)),
            ],
            out_specs=pl.BlockSpec((M, wc_out), lambda g: (g, 0)),
            scratch_shapes=[
                pltpu.VMEM((B * (H + 2), wc_in), jnp.float32),
                pltpu.VMEM((B * (H + 2), wc_out), jnp.float32),
            ],
        ),
        compiler_params=pltpu.CompilerParams(
            dimension_semantics=("parallel",)),
        cost_estimate=pl.CostEstimate(
            flops=flops, transcendentals=0, bytes_accessed=bytes_accessed),
    )(x_packed, w1m, b1p, w2m, b2p)


def _fold_bn(w_hwio, conv_b, gamma, beta, mean, var, eps=1e-5):
    """Fold eval-mode BN + conv bias into the conv weights and a bias vector."""
    s = gamma / jnp.sqrt(var + eps)                       # (cout,)
    w_scaled = w_hwio * s[None, None, None, :]
    b = beta + (conv_b - mean) * s
    return w_scaled, b


def _banded_weight(w_hwio, W):
    """(3,3,cin,cout) HWIO weights -> (3, W*cin, W*cout) block-banded matrices.

    Wmat[kh, w_in*cin+ci, w_out*cout+co] = w[kh, kw, ci, co] with
    kw = w_in - w_out + 1 in [0,3); clipped taps implement the W zero-padding.
    """
    _, _, cin, cout = w_hwio.shape
    w_out = jnp.arange(W)[:, None, None]
    kw = jnp.arange(3)[None, :, None]
    w_in = jnp.arange(W)[None, None, :]
    ind = (w_in == w_out + kw - 1).astype(w_hwio.dtype)   # (W_out, kw, W_in)
    m = jnp.einsum('okw,hkic->hwioc', ind, w_hwio)        # (3, W_in, cin, W_out, cout)
    return m.reshape(3, W * cin, W * cout)


def _default_num_groups(n_batch):
    """2-way 'parallel' batch split on two-TensorCore chips (v7x); otherwise fold
    the whole batch into one grid step (best for single-TC v5e/v6e)."""
    try:
        kind = jax.devices()[0].device_kind.lower()
    except Exception:
        kind = ""
    if ("v7" in kind or "7x" in kind) and n_batch % 2 == 0:
        return 2
    return 1


@functools.partial(jax.jit, static_argnames=("num_groups",))
def double_conv_forward(x_nchw, params, num_groups=1):
    """Equivalent of double_conv.forward on NCHW input (eval-mode BatchNorm)."""
    (w1, cb1, g1, bt1, m1, v1), (w2, cb2, g2, bt2, m2, v2) = params
    N, cin, H, W = x_nchw.shape
    cout = w1.shape[-1]
    assert N % num_groups == 0

    w1s, b1 = _fold_bn(w1, cb1, g1, bt1, m1, v1)
    w2s, b2 = _fold_bn(w2, cb2, g2, bt2, m2, v2)
    # banded (3, W*Cin, W*Cout) -> merged-tap (3*W*Cin, W*Cout), bf16 MXU operands
    w1m = _banded_weight(w1s, W).reshape(3 * W * cin, W * cout).astype(jnp.bfloat16)
    w2m = _banded_weight(w2s, W).reshape(3 * W * cout, W * cout).astype(jnp.bfloat16)
    b1p = jnp.tile(b1, W).reshape(1, W * cout)
    b2p = jnp.tile(b2, W).reshape(1, W * cout)

    # NCHW -> NHWC -> lane-packed (N*H, W*Cin); batch folded into matmul M.
    x_packed = jnp.transpose(x_nchw, (0, 2, 3, 1)).astype(jnp.float32)
    x_packed = x_packed.reshape(N * H, W * cin)

    y_packed = _double_conv_pallas(x_packed, w1m, b1p, w2m, b2p,
                                   N=N, H=H, W=W, cin=cin, cout=cout,
                                   num_groups=num_groups)
    y = y_packed.reshape(N, H, W, cout)
    return jnp.transpose(y, (0, 3, 1, 2))                 # back to NCHW


def init_double_conv_params(key, in_ch, out_ch):
    """Deterministic synthetic params matching nn.Conv2d / nn.BatchNorm2d shapes."""
    ks = jax.random.split(key, 12)

    def make_layer(keys, cin, cout):
        kw_, kb, kg, kbeta, km, kv = keys
        bound = 1.0 / jnp.sqrt(cin * 9.0)
        w_oihw = jax.random.uniform(kw_, (cout, cin, 3, 3), jnp.float32, -bound, bound)
        w_hwio = jnp.transpose(w_oihw, (2, 3, 1, 0))      # PyTorch OIHW -> HWIO
        conv_b = jax.random.uniform(kb, (cout,), jnp.float32, -bound, bound)
        gamma = jax.random.uniform(kg, (cout,), jnp.float32, 0.5, 1.5)
        beta = jax.random.uniform(kbeta, (cout,), jnp.float32, -0.5, 0.5)
        run_mean = 0.1 * jax.random.normal(km, (cout,), jnp.float32)
        run_var = jax.random.uniform(kv, (cout,), jnp.float32, 0.5, 1.5)
        return (w_hwio, conv_b, gamma, beta, run_mean, run_var)

    return (make_layer(ks[0:6], in_ch, out_ch),
            make_layer(ks[6:12], out_ch, out_ch))


def double_conv_reference(x_nchw, params, eps=1e-5):
    """Pure-JAX reference (lax conv + eval-mode BN + ReLU), NCHW in/out."""
    y = jnp.transpose(x_nchw, (0, 2, 3, 1)).astype(jnp.float32)
    for (w_hwio, conv_b, gamma, beta, mean, var) in params:
        y = jax.lax.conv_general_dilated(
            y, w_hwio, window_strides=(1, 1), padding="SAME",
            dimension_numbers=("NHWC", "HWIO", "NHWC"))
        y = (y + conv_b - mean) / jnp.sqrt(var + eps) * gamma + beta
        y = jnp.maximum(y, 0.0)
    return jnp.transpose(y, (0, 3, 1, 2))


if __name__ == "__main__":
    key = jax.random.PRNGKey(0)
    k_x, k_p = jax.random.split(key)

    N, in_ch, out_ch, H, W = 2, 4, 8, 16, 16
    x = jax.random.normal(k_x, (N, in_ch, H, W), jnp.float32)
    params = init_double_conv_params(k_p, in_ch, out_ch)

    num_groups = _default_num_groups(N)
    y = double_conv_forward(x, params, num_groups=num_groups)
    jax.block_until_ready(y)
    assert y.shape == (N, out_ch, H, W), y.shape

    y_ref = double_conv_reference(x, params)
    err = float(jnp.max(jnp.abs(y - y_ref)))
    assert jnp.allclose(y, y_ref, atol=1e-2, rtol=1e-2), err

    print("KERNEL_OK")
</pallas_src>

<mosaic_0001>
module attributes {stable_mosaic.version = 11 : i64} {
  func.func @_double_conv_kernel(%arg0: i32, %arg1: memref<32x64xf32, #tpu.memory_space<vmem>>, %arg2: memref<192x128xbf16, #tpu.memory_space<vmem>>, %arg3: memref<1x128xf32, #tpu.memory_space<vmem>>, %arg4: memref<384x128xbf16, #tpu.memory_space<vmem>>, %arg5: memref<1x128xf32, #tpu.memory_space<vmem>>, %arg6: memref<32x128xf32, #tpu.memory_space<vmem>>, %arg7: memref<36x64xf32, #tpu.memory_space<vmem>>, %arg8: memref<36x128xf32, #tpu.memory_space<vmem>>) attributes {dimension_semantics = [#tpu.dimension_semantics<parallel>], iteration_bounds = array<i64: 1>, scalar_prefetch = 0 : i64, scratch_operands = 2 : i64, tpu.core_type = #tpu.core_type<tc>, window_params = [{transform_indices = @transform_0, window_bounds = array<i64: 32, 64>}, {pipeline_mode = #tpu.pipeline_mode<synchronous>, transform_indices = @transform_1, window_bounds = array<i64: 192, 128>}, {pipeline_mode = #tpu.pipeline_mode<synchronous>, transform_indices = @transform_2, window_bounds = array<i64: 1, 128>}, {pipeline_mode = #tpu.pipeline_mode<synchronous>, transform_indices = @transform_3, window_bounds = array<i64: 384, 128>}, {pipeline_mode = #tpu.pipeline_mode<synchronous>, transform_indices = @transform_4, window_bounds = array<i64: 1, 128>}, {transform_indices = @transform_5, window_bounds = array<i64: 32, 128>}]} {
    %cst = arith.constant 0.000000e+00 : f32
    %0 = vector.broadcast %cst : f32 to vector<1x64xf32>
    %c0 = arith.constant 0 : index
    %c0_0 = arith.constant 0 : index
    %1 = vector.load %arg7[%c0, %c0_0] : memref<36x64xf32, #tpu.memory_space<vmem>>, vector<1x64xf32>
    tpu.vector_store %arg7[%c0, %c0_0], %0 {strides = array<i32>} : memref<36x64xf32, #tpu.memory_space<vmem>>, vector<1x64xf32>,
    %cst_1 = arith.constant 0.000000e+00 : f32
    %2 = vector.broadcast %cst_1 : f32 to vector<1x64xf32>
    %c17 = arith.constant 17 : index
    %c0_2 = arith.constant 0 : index
    %3 = vector.load %arg7[%c17, %c0_2] : memref<36x64xf32, #tpu.memory_space<vmem>>, vector<1x64xf32>
    tpu.vector_store %arg7[%c17, %c0_2], %2 {strides = array<i32>} : memref<36x64xf32, #tpu.memory_space<vmem>>, vector<1x64xf32>,
    %c0_3 = arith.constant 0 : index
    %c0_4 = arith.constant 0 : index
    %4 = vector.load %arg1[%c0_3, %c0_4] : memref<32x64xf32, #tpu.memory_space<vmem>>, vector<16x64xf32>
    %c1 = arith.constant 1 : index
    %c0_5 = arith.constant 0 : index
    %5 = vector.load %arg7[%c1, %c0_5] : memref<36x64xf32, #tpu.memory_space<vmem>>, vector<16x64xf32>
    tpu.vector_store %arg7[%c1, %c0_5], %4 {strides = array<i32>} : memref<36x64xf32, #tpu.memory_space<vmem>>, vector<16x64xf32>,
    %cst_6 = arith.constant 0.000000e+00 : f32
    %6 = vector.broadcast %cst_6 : f32 to vector<1x64xf32>
    %c18 = arith.constant 18 : index
    %c0_7 = arith.constant 0 : index
    %7 = vector.load %arg7[%c18, %c0_7] : memref<36x64xf32, #tpu.memory_space<vmem>>, vector<1x64xf32>
    tpu.vector_store %arg7[%c18, %c0_7], %6 {strides = array<i32>} : memref<36x64xf32, #tpu.memory_space<vmem>>, vector<1x64xf32>,
    %cst_8 = arith.constant 0.000000e+00 : f32
    %8 = vector.broadcast %cst_8 : f32 to vector<1x64xf32>
    %c35 = arith.constant 35 : index
    %c0_9 = arith.constant 0 : index
    %9 = vector.load %arg7[%c35, %c0_9] : memref<36x64xf32, #tpu.memory_space<vmem>>, vector<1x64xf32>
    tpu.vector_store %arg7[%c35, %c0_9], %8 {strides = array<i32>} : memref<36x64xf32, #tpu.memory_space<vmem>>, vector<1x64xf32>,
    %c16 = arith.constant 16 : index
    %c0_10 = arith.constant 0 : index
    %10 = vector.load %arg1[%c16, %c0_10] : memref<32x64xf32, #tpu.memory_space<vmem>>, vector<16x64xf32>
    %c19 = arith.constant 19 : index
    %c0_11 = arith.constant 0 : index
    %11 = vector.load %arg7[%c19, %c0_11] : memref<36x64xf32, #tpu.memory_space<vmem>>, vector<16x64xf32>
    tpu.vector_store %arg7[%c19, %c0_11], %10 {strides = array<i32>} : memref<36x64xf32, #tpu.memory_space<vmem>>, vector<16x64xf32>,
    %c0_12 = arith.constant 0 : index
    %c0_13 = arith.constant 0 : index
    %12 = vector.load %arg7[%c0_12, %c0_13] : memref<36x64xf32, #tpu.memory_space<vmem>>, vector<16x64xf32>
    %c18_14 = arith.constant 18 : index
    %c0_15 = arith.constant 0 : index
    %13 = vector.load %arg7[%c18_14, %c0_15] : memref<36x64xf32, #tpu.memory_space<vmem>>, vector<16x64xf32>
    %14 = tpu.concatenate %12, %13 in 0 : vector<16x64xf32>, vector<16x64xf32> -> vector<32x64xf32>
    %c1_16 = arith.constant 1 : index
    %c0_17 = arith.constant 0 : index
    %15 = vector.load %arg7[%c1_16, %c0_17] : memref<36x64xf32, #tpu.memory_space<vmem>>, vector<16x64xf32>
    %c19_18 = arith.constant 19 : index
    %c0_19 = arith.constant 0 : index
    %16 = vector.load %arg7[%c19_18, %c0_19] : memref<36x64xf32, #tpu.memory_space<vmem>>, vector<16x64xf32>
    %17 = tpu.concatenate %15, %16 in 0 : vector<16x64xf32>, vector<16x64xf32> -> vector<32x64xf32>
    %c2 = arith.constant 2 : index
    %c0_20 = arith.constant 0 : index
    %18 = vector.load %arg7[%c2, %c0_20] : memref<36x64xf32, #tpu.memory_space<vmem>>, vector<16x64xf32>
    %c20 = arith.constant 20 : index
    %c0_21 = arith.constant 0 : index
    %19 = vector.load %arg7[%c20, %c0_21] : memref<36x64xf32, #tpu.memory_space<vmem>>, vector<16x64xf32>
    %20 = tpu.concatenate %18, %19 in 0 : vector<16x64xf32>, vector<16x64xf32> -> vector<32x64xf32>
    %21 = tpu.concatenate %14, %17, %20 in 1 : vector<32x64xf32>, vector<32x64xf32>, vector<32x64xf32> -> vector<32x192xf32>
    %22 = arith.truncf %21 : vector<32x192xf32> to vector<32x192xbf16>
    %c0_22 = arith.constant 0 : index
    %c0_23 = arith.constant 0 : index
    %23 = vector.load %arg2[%c0_22, %c0_23] : memref<192x128xbf16, #tpu.memory_space<vmem>>, vector<192x128xbf16>
    %cst_24 = arith.constant dense<0.000000e+00> : vector<32x128xf32>
    %24 = tpu.matmul %22, %23, %cst_24 {dimension_numbers = #tpu.dot_dimension_numbers<[1], [0], [0], [1], [0, 0, 1, 1], [], []>} : vector<32x192xbf16>, vector<192x128xbf16>, vector<32x128xf32> -> vector<32x128xf32>
    %c0_25 = arith.constant 0 : index
    %c0_26 = arith.constant 0 : index
    %25 = vector.load %arg3[%c0_25, %c0_26] : memref<1x128xf32, #tpu.memory_space<vmem>>, vector<1x128xf32>
    %26 = vector.broadcast %25 : vector<1x128xf32> to vector<32x128xf32>
    %27 = arith.addf %24, %26 : vector<32x128xf32>
    %cst_27 = arith.constant 0.000000e+00 : f32
    %28 = vector.broadcast %cst_27 : f32 to vector<32x128xf32>
    %29 = arith.maximumf %27, %28 : vector<32x128xf32>
    %cst_28 = arith.constant 0.000000e+00 : f32
    %30 = vector.broadcast %cst_28 : f32 to vector<1x128xf32>
    %c0_29 = arith.constant 0 : index
    %c0_30 = arith.constant 0 : index
    %31 = vector.load %arg8[%c0_29, %c0_30] : memref<36x128xf32, #tpu.memory_space<vmem>>, vector<1x128xf32>
    tpu.vector_store %arg8[%c0_29, %c0_30], %30 {strides = array<i32>} : memref<36x128xf32, #tpu.memory_space<vmem>>, vector<1x128xf32>,
    %cst_31 = arith.constant 0.000000e+00 : f32
    %32 = vector.broadcast %cst_31 : f32 to vector<1x128xf32>
    %c17_32 = arith.constant 17 : index
    %c0_33 = arith.constant 0 : index
    %33 = vector.load %arg8[%c17_32, %c0_33] : memref<36x128xf32, #tpu.memory_space<vmem>>, vector<1x128xf32>
    tpu.vector_store %arg8[%c17_32, %c0_33], %32 {strides = array<i32>} : memref<36x128xf32, #tpu.memory_space<vmem>>, vector<1x128xf32>,
    %34 = vector.extract_strided_slice %29 {offsets = [0, 0], sizes = [16, 128], strides = [1, 1]} : vector<32x128xf32> to vector<16x128xf32>
    %c1_34 = arith.constant 1 : index
    %c0_35 = arith.constant 0 : index
    %35 = vector.load %arg8[%c1_34, %c0_35] : memref<36x128xf32, #tpu.memory_space<vmem>>, vector<16x128xf32>
    tpu.vector_store %arg8[%c1_34, %c0_35], %34 {strides = array<i32>} : memref<36x128xf32, #tpu.memory_space<vmem>>, vector<16x128xf32>,
    %cst_36 = arith.constant 0.000000e+00 : f32
    %36 = vector.broadcast %cst_36 : f32 to vector<1x128xf32>
    %c18_37 = arith.constant 18 : index
    %c0_38 = arith.constant 0 : index
    %37 = vector.load %arg8[%c18_37, %c0_38] : memref<36x128xf32, #tpu.memory_space<vmem>>, vector<1x128xf32>
    tpu.vector_store %arg8[%c18_37, %c0_38], %36 {strides = array<i32>} : memref<36x128xf32, #tpu.memory_space<vmem>>, vector<1x128xf32>,
    %cst_39 = arith.constant 0.000000e+00 : f32
    %38 = vector.broadcast %cst_39 : f32 to vector<1x128xf32>
    %c35_40 = arith.constant 35 : index
    %c0_41 = arith.constant 0 : index
    %39 = vector.load %arg8[%c35_40, %c0_41] : memref<36x128xf32, #tpu.memory_space<vmem>>, vector<1x128xf32>
    tpu.vector_store %arg8[%c35_40, %c0_41], %38 {strides = array<i32>} : memref<36x128xf32, #tpu.memory_space<vmem>>, vector<1x128xf32>,
    %40 = vector.extract_strided_slice %29 {offsets = [16, 0], sizes = [16, 128], strides = [1, 1]} : vector<32x128xf32> to vector<16x128xf32>
    %c19_42 = arith.constant 19 : index
    %c0_43 = arith.constant 0 : index
    %41 = vector.load %arg8[%c19_42, %c0_43] : memref<36x128xf32, #tpu.memory_space<vmem>>, vector<16x128xf32>
    tpu.vector_store %arg8[%c19_42, %c0_43], %40 {strides = array<i32>} : memref<36x128xf32, #tpu.memory_space<vmem>>, vector<16x128xf32>,
    %c0_44 = arith.constant 0 : index
    %c0_45 = arith.constant 0 : index
    %42 = vector.load %arg8[%c0_44, %c0_45] : memref<36x128xf32, #tpu.memory_space<vmem>>, vector<16x128xf32>
    %c18_46 = arith.constant 18 : index
    %c0_47 = arith.constant 0 : index
    %43 = vector.load %arg8[%c18_46, %c0_47] : memref<36x128xf32, #tpu.memory_space<vmem>>, vector<16x128xf32>
    %44 = tpu.concatenate %42, %43 in 0 : vector<16x128xf32>, vector<16x128xf32> -> vector<32x128xf32>
    %c1_48 = arith.constant 1 : index
    %c0_49 = arith.constant 0 : index
    %45 = vector.load %arg8[%c1_48, %c0_49] : memref<36x128xf32, #tpu.memory_space<vmem>>, vector<16x128xf32>
    %c19_50 = arith.constant 19 : index
    %c0_51 = arith.constant 0 : index
    %46 = vector.load %arg8[%c19_50, %c0_51] : memref<36x128xf32, #tpu.memory_space<vmem>>, vector<16x128xf32>
    %47 = tpu.concatenate %45, %46 in 0 : vector<16x128xf32>, vector<16x128xf32> -> vector<32x128xf32>
    %c2_52 = arith.constant 2 : index
    %c0_53 = arith.constant 0 : index
    %48 = vector.load %arg8[%c2_52, %c0_53] : memref<36x128xf32, #tpu.memory_space<vmem>>, vector<16x128xf32>
    %c20_54 = arith.constant 20 : index
    %c0_55 = arith.constant 0 : index
    %49 = vector.load %arg8[%c20_54, %c0_55] : memref<36x128xf32, #tpu.memory_space<vmem>>, vector<16x128xf32>
    %50 = tpu.concatenate %48, %49 in 0 : vector<16x128xf32>, vector<16x128xf32> -> vector<32x128xf32>
    %51 = tpu.concatenate %44, %47, %50 in 1 : vector<32x128xf32>, vector<32x128xf32>, vector<32x128xf32> -> vector<32x384xf32>
    %52 = arith.truncf %51 : vector<32x384xf32> to vector<32x384xbf16>
    %c0_56 = arith.constant 0 : index
    %c0_57 = arith.constant 0 : index
    %53 = vector.load %arg4[%c0_56, %c0_57] : memref<384x128xbf16, #tpu.memory_space<vmem>>, vector<384x128xbf16>
    %cst_58 = arith.constant dense<0.000000e+00> : vector<32x128xf32>
    %54 = tpu.matmul %52, %53, %cst_58 {dimension_numbers = #tpu.dot_dimension_numbers<[1], [0], [0], [1], [0, 0, 1, 1], [], []>} : vector<32x384xbf16>, vector<384x128xbf16>, vector<32x128xf32> -> vector<32x128xf32>
    %c0_59 = arith.constant 0 : index
    %c0_60 = arith.constant 0 : index
    %55 = vector.load %arg5[%c0_59, %c0_60] : memref<1x128xf32, #tpu.memory_space<vmem>>, vector<1x128xf32>
    %56 = vector.broadcast %55 : vector<1x128xf32> to vector<32x128xf32>
    %57 = arith.addf %54, %56 : vector<32x128xf32>
    %cst_61 = arith.constant 0.000000e+00 : f32
    %58 = vector.broadcast %cst_61 : f32 to vector<32x128xf32>
    %59 = arith.maximumf %57, %58 : vector<32x128xf32>
    %c0_62 = arith.constant 0 : index
    %c0_63 = arith.constant 0 : index
    %60 = vector.load %arg6[%c0_62, %c0_63] : memref<32x128xf32, #tpu.memory_space<vmem>>, vector<32x128xf32>
    tpu.vector_store %arg6[%c0_62, %c0_63], %59 {strides = array<i32>} : memref<32x128xf32, #tpu.memory_space<vmem>>, vector<32x128xf32>,
    return
  }
  func.func @transform_0(%arg0: i32) -> (i32, i32) {
    %c0_i32 = arith.constant 0 : i32
    %c0_i32_0 = arith.constant 0 : i32
    return %arg0, %c0_i32 : i32, i32
  }
  func.func @transform_1(%arg0: i32) -> (i32, i32) {
    %c0_i32 = arith.constant 0 : i32
    %c0_i32_0 = arith.constant 0 : i32
    %c0_i32_1 = arith.constant 0 : i32
    return %c0_i32, %c0_i32_0 : i32, i32
  }
  func.func @transform_2(%arg0: i32) -> (i32, i32) {
    %c0_i32 = arith.constant 0 : i32
    %c0_i32_0 = arith.constant 0 : i32
    %c0_i32_1 = arith.constant 0 : i32
    return %c0_i32, %c0_i32_0 : i32, i32
  }
  func.func @transform_3(%arg0: i32) -> (i32, i32) {
    %c0_i32 = arith.constant 0 : i32
    %c0_i32_0 = arith.constant 0 : i32
    %c0_i32_1 = arith.constant 0 : i32
    return %c0_i32, %c0_i32_0 : i32, i32
  }
  func.func @transform_4(%arg0: i32) -> (i32, i32) {
    %c0_i32 = arith.constant 0 : i32
    %c0_i32_0 = arith.constant 0 : i32
    %c0_i32_1 = arith.constant 0 : i32
    return %c0_i32, %c0_i32_0 : i32, i32
  }
  func.func @transform_5(%arg0: i32) -> (i32, i32) {
    %c0_i32 = arith.constant 0 : i32
    %c0_i32_0 = arith.constant 0 : i32
    return %arg0, %c0_i32 : i32, i32
  }
}

</mosaic_0001>

<bundles_post_ra>
// kernel: tile.13
= control target key start
LH: loop header
LB: loop body
LE: loop exit
PB: predicated region body
PF: predicated region fallthrough
CT: control target
= control target key end

     0   :  { %s28_s0 = inlined_call_operand.vmem [shape: f32[8], index: 0, kind: input, shape index: {}]   ;;  %s29_s1 = inlined_call_operand.vmem [shape: f32[16,8], index: 1, kind: output, shape index: {}]  }
   0x1   :  { %v4_v0 = vld [vmem:[%s28_s0] ss:$0 sm:$0xff] }
   0x2   :  { %5 = vst [vmem:[%s29_s1] sm:$0xff] %v4_v0 }
   0x3   :  { %8 = vst [vmem:[%s29_s1 + $0x8] sm:$0xff] %v4_v0 }

// kernel: tile.14
= control target key start
LH: loop header
LB: loop body
LE: loop exit
PB: predicated region body
PF: predicated region fallthrough
CT: control target
= control target key end

     0   :  { %s131_s10 = smov 120   ;;  %s132_s11 = smov 104   ;;  %vm3_vm0 = vcmask 64512   ;;  %vm9_vm1 = vcmask 1048512   ;;  %vm15_vm2 = vcmask 982912   ;;  %vm21_vm3 = vcmask 917312   ;;  %s207_s0 = inlined_call_operand.vmem [shape: f32[16,8], index: 0, kind: input, shape index: {}]   ;;  %s208_s1 = inlined_call_operand.vmem [shape: f32[1,128], index: 1, kind: output, shape index: {}]  }
   0x1   :  { %v101_v0 = vld [vmem:[%s207_s0 + $0xf] sm:$0x1]   ;;  %v103_v1 = vld [vmem:[%s207_s0 + $0xd] sm:$0x1]   ;;  %v105_v2 = vld [vmem:[%s207_s0 + $0xb] sm:$0x1]  }
   0x2   :  { %7 = vrot.lane.b32.xlu0 %v101_v0, %s131_s10  ;;  %19 = vrot.lane.b32.xlu1 %v103_v1, %s132_s11  ;;  %s133_s14 = smov 88   ;;  %v102_v3 = vld [vmem:[%s207_s0 + $0xe] sm:$0x1]   ;;  %v104_v4 = vld [vmem:[%s207_s0 + $0xc] sm:$0x1]   ;;  %s134_s19 = smov 112  }
   0x3   :  { %31 = vrot.lane.b32.xlu2 %v105_v2, %s133_s14  ;;  %s135_s20 = smov 96   ;;  %v106_v5 = vld [vmem:[%s207_s0 + $0xa] sm:$0x1]   ;;  %s136_s23 = smov 80   ;;  %v107_v6 = vld [vmem:[%s207_s0 + $0x9] sm:$0x1]  }
   0x4   :  { %v108_v7 = vld [vmem:[%s207_s0 + $0x8] sm:$0x1]   ;;  %s137_s28 = smov 72   ;;  %s138_s29 = smov 64   ;;  %v109_v8 = vld [vmem:[%s207_s0 + $0x7] sm:$0x1]  }
   0x5   :  { %s139_s3 = smov 56   ;;  %v110_v9 = vld [vmem:[%s207_s0 + $0x6] sm:$0x1]   ;;  %v111_v10 = vld [vmem:[%s207_s0 + $0x5] sm:$0x1]   ;;  %s140_s8 = smov 48  }
   0x6   :  { %s141_s9 = smov 40   ;;  %v112_v11 = vld [vmem:[%s207_s0 + $0x4] sm:$0x1]   ;;  %s142_s12 = smov 32   ;;  %v113_v12 = vld [vmem:[%s207_s0 + $0x3] sm:$0x1]  }
   0x7   :  { %v114_v13 = vld [vmem:[%s207_s0 + $0x2] sm:$0x1]   ;;  %s143_s17 = smov 24   ;;  %s144_s18 = smov 16   ;;  %v115_v14 = vld [vmem:[%s207_s0 + $0x1] sm:$0x1]  }
   0x8   :  { %s145_s21 = smov 8   ;;  %v2_v15 = vld [vmem:[%s207_s0] sm:$0x1]   ;;  %vm27_vm4 = vcmask 851712   ;;  %vm33_vm5 = vcmask 786112   ;;  %vm39_vm6 = vcmask 720512  }
   0x9   :  { %4 = vst.msk [vmem:[#allocation0] sm:$0x1] %vm3_vm0, %v2_v15   ;;  %vm45_vm7 = vcmask 654912   ;;  %vm51_vm8 = vcmask 589312   ;;  %vm57_vm9 = vcmask 523712   ;;  %vm63_vm10 = vcmask 458112  }
   0xa   :  { %13 = vrot.lane.b32.xlu0 %v102_v3, %s134_s19  ;;  %25 = vrot.lane.b32.xlu1 %v104_v4, %s135_s20  ;;  %vm69_vm11 = vcmask 392512   ;;  %vm75_vm12 = vcmask 326912   ;;  %vm81_vm13 = vcmask 261312   ;;  %vm87_vm14 = vcmask 195712  }
   0xb   :  { %37 = vrot.lane.b32.xlu2 %v106_v5, %s136_s23  ;;  %vm93_vm15 = vcmask 130112  }
  0x12   :  { %43 = vrot.lane.b32.xlu0 %v107_v6, %s137_s28  ;;  %49 = vrot.lane.b32.xlu1 %v108_v7, %s138_s29 }
  0x13   :  { %55 = vrot.lane.b32.xlu2 %v109_v8, %s139_s3 }
  0x1a   :  { %61 = vrot.lane.b32.xlu0 %v110_v9, %s140_s8  ;;  %67 = vrot.lane.b32.xlu1 %v111_v10, %s141_s9 }
  0x1b   :  { %73 = vrot.lane.b32.xlu2 %v112_v11, %s142_s12 }
  0x22   :  { %79 = vrot.lane.b32.xlu0 %v113_v12, %s143_s17  ;;  %85 = vrot.lane.b32.xlu1 %v114_v13, %s144_s18 }
  0x23   :  { %91 = vrot.lane.b32.xlu2 %v115_v14, %s145_s21 }
  0x5d   :  { %v32_v16 = vpop.permute.xlu2 %31  }
  0x65   :  { %v38_v17 = vpop.permute.xlu2 %37  }
  0x6d   :  { %v56_v18 = vpop.permute.xlu2 %55  }
  0x74   :  { %v8_v19 = vpop.permute.xlu0 %7   ;;  %v20_v20 = vpop.permute.xlu1 %19  }
  0x75   :  { %10 = vst.msk [vmem:[#allocation0] sm:$0x1] %vm9_vm1, %v8_v19   ;;  %v74_v21 = vpop.permute.xlu2 %73  }
  0x7c   :  { %v14_v22 = vpop.permute.xlu0 %13   ;;  %v26_v23 = vpop.permute.xlu1 %25  }
  0x7d   :  { %16 = vst.msk [vmem:[#allocation0] sm:$0x1] %vm15_vm2, %v14_v22   ;;  %v92_v24 = vpop.permute.xlu2 %91  }
  0x7e   :  { %22 = vst.msk [vmem:[#allocation0] sm:$0x1] %vm21_vm3, %v20_v20  }
  0x7f   :  { %28 = vst.msk [vmem:[#allocation0] sm:$0x1] %vm27_vm4, %v26_v23  }
  0x80   :  { %34 = vst.msk [vmem:[#allocation0] sm:$0x1] %vm33_vm5, %v32_v16  }
  0x81   :  { %40 = vst.msk [vmem:[#allocation0] sm:$0x1] %vm39_vm6, %v38_v17  }
  0x84   :  { %v44_v25 = vpop.permute.xlu0 %43   ;;  %v50_v26 = vpop.permute.xlu1 %49  }
  0x85   :  { %46 = vst.msk [vmem:[#allocation0] sm:$0x1] %vm45_vm7, %v44_v25  }
  0x86   :  { %52 = vst.msk [vmem:[#allocation0] sm:$0x1] %vm51_vm8, %v50_v26  }
  0x87   :  { %58 = vst.msk [vmem:[#allocation0] sm:$0x1] %vm57_vm9, %v56_v18  }
  0x8c   :  { %v62_v27 = vpop.permute.xlu0 %61   ;;  %v68_v28 = vpop.permute.xlu1 %67  }
  0x8d   :  { %64 = vst.msk [vmem:[#allocation0] sm:$0x1] %vm63_vm10, %v62_v27  }
  0x8e   :  { %70 = vst.msk [vmem:[#allocation0] sm:$0x1] %vm69_vm11, %v68_v28  }
  0x8f   :  { %76 = vst.msk [vmem:[#allocation0] sm:$0x1] %vm75_vm12, %v74_v21  }
  0x94   :  { %v80_v29 = vpop.permute.xlu0 %79   ;;  %v86_v30 = vpop.permute.xlu1 %85  }
  0x95   :  { %82 = vst.msk [vmem:[#allocation0] sm:$0x1] %vm81_vm13, %v80_v29  }
  0x96   :  { %88 = vst.msk [vmem:[#allocation0] sm:$0x1] %vm87_vm14, %v86_v30  }
  0x97   :  { %94 = vst.msk [vmem:[#allocation0] sm:$0x1] %vm93_vm15, %v92_v24  }
  0x9e   :  { %v97_v31 = vld [vmem:[#allocation0] sm:$0x1] }
  0x9f   :  { %100 = vst [vmem:[%s208_s1] sm:$0x1] %v97_v31 }

// kernel: double_conv_forward.1
= control target key start
LH: loop header
LB: loop body
LE: loop exit
PB: predicated region body
PF: predicated region fallthrough
CT: control target
= control target key end

     0   :  { %vm26_vm0 = vcmask 523264   ;;  %vm21_vm1 = vcmask 516096   ;;  %v706_v3 = vmov 0.0   ;;  %s707_s14 = smov 64   ;;  %s890_s0 = inlined_call_operand.vmem [shape: f32[32,64], index: 0, kind: input, shape index: {}]   ;;  %s891_s1 = inlined_call_operand.vmem [shape: bf16[192,128], index: 1, kind: input, shape index: {}]   ;;  %s892_s2 = inlined_call_operand.vmem [shape: f32[1,128], index: 2, kind: input, shape index: {}]   ;;  %s893_s3 = inlined_call_operand.vmem [shape: bf16[384,128], index: 3, kind: input, shape index: {}]   ;;  %s894_s4 = inlined_call_operand.vmem [shape: f32[1,128], index: 4, kind: input, shape index: {}]   ;;  %s895_s5 = inlined_call_operand.vmem [shape: f32[32,128], index: 5, kind: output, shape index: {}]  }
   0x1   :  { %v24_v0 = vld [vmem:[%s890_s0] sm:$0xff]  ;;  %v25_v1 = vld [vmem:[%s890_s0 + $0x8] sm:$0xff]  ;;  %v31_v2 = vld [vmem:[%s890_s0 + $0x10] sm:$0xff]  ;;  %23 = vst.msk [vmem:[#allocation2 + $0x11] sm:$0x1] %vm21_vm1, %v706_v3 }
   0x2   :  { %27 = vst.msk [vmem:[#allocation2 + $0x1] sm:$0xff] %vm26_vm0, %v24_v0  ;;  %v32_v4 = vld [vmem:[%s890_s0 + $0x18] sm:$0xff]  ;;  %v662_v7 = vld [vmem:[%s891_s1 + $0x30] sm:$0xff]  ;;  %v661_v9 = vld [vmem:[%s891_s1 + $0x28] sm:$0xff] }
   0x3   :  { %v663_v5 = vld [vmem:[%s891_s1 + $0x38] sm:$0xff]  ;;  %28 = vst.msk [vmem:[#allocation2 + $0x9] sm:$0xff] %vm26_vm0, %v25_v1  ;;  %v666_v8 = vld [vmem:[%s891_s1 + $0x50] sm:$0xff]  ;;  %v665_v11 = vld [vmem:[%s891_s1 + $0x48] sm:$0xff] }
   0x4   :  { %v667_v6 = vld [vmem:[%s891_s1 + $0x58] sm:$0xff]  ;;  %33 = vst.msk [vmem:[#allocation2 + $0x13] sm:$0xff] %vm26_vm0, %v31_v2  ;;  %177 = vmatpush.bf16.msra.mxu0 %v663_v5  ;;  %v660_v14 = vld [vmem:[%s891_s1 + $0x20] sm:$0xff]  ;;  %v658_v23 = vld [vmem:[%s891_s1 + $0x10] sm:$0xff] }
   0x5   :  { %34 = vst.msk [vmem:[#allocation2 + $0x1b] sm:$0xff] %vm26_vm0, %v32_v4  ;;  %200 = vmatpush.bf16.msra.mxu1 %v667_v6  ;;  %v664_v15 = vld [vmem:[%s891_s1 + $0x40] sm:$0xff]  ;;  %v659_v20 = vld [vmem:[%s891_s1 + $0x18] sm:$0xff]  ;;  %v657_v24 = vld [vmem:[%s891_s1 + $0x8] sm:$0xff] }
   0x6   :  { %22 = vst.msk [vmem:[#allocation2] sm:$0x1] %vm21_vm1, %v706_v3  ;;  %v656_v25 = vld [vmem:[%s891_s1] sm:$0xff]  ;;  %v675_v29 = vld [vmem:[%s893_s3 + $0x38] sm:$0xff]  ;;  %v674_v32 = vld [vmem:[%s893_s3 + $0x30] sm:$0xff] }
   0x7   :  { %29 = vst.msk [vmem:[#allocation2 + $0x12] sm:$0x1] %vm21_vm1, %v706_v3  ;;  %v683_v30 = vld [vmem:[%s893_s3 + $0x78] sm:$0xff]  ;;  %441 = vmatpush.bf16.msra.mxu2 %v675_v29  ;;  %v682_v33 = vld [vmem:[%s893_s3 + $0x70] sm:$0xff]  ;;  %v681_v51 = vld [vmem:[%s893_s3 + $0x68] sm:$0xff] }
   0x8   :  { %178 = vmatpush.bf16.msra.mxu0 %v662_v7  ;;  %30 = vst.msk [vmem:[#allocation2 + $0x23] sm:$0x1] %vm21_vm1, %v706_v3  ;;  %v691_v31 = vld [vmem:[%s893_s3 + $0xb8] sm:$0xff]  ;;  %460 = vmatpush.bf16.msra.mxu3 %v683_v30  ;;  %v690_v34 = vld [vmem:[%s893_s3 + $0xb0] sm:$0xff]  ;;  %v680_v52 = vld [vmem:[%s893_s3 + $0x60] sm:$0xff] }
   0x9   :  { %v39_v10 = vld [vmem:[#allocation2 + $0x1] sm:$0xff]  ;;  %201 = vmatpush.bf16.msra.mxu1 %v666_v8  ;;  %219 = vst [vmem:[#allocation3] sm:$0x1] %v706_v3  ;;  %v679_v55 = vld [vmem:[%s893_s3 + $0x58] sm:$0xff]  ;;  %v678_v58 = vld [vmem:[%s893_s3 + $0x50] sm:$0xff] }
   0xa   :  { %v40_v12 = vld [vmem:[#allocation2 + $0x9] sm:$0xff]  ;;  %220 = vst [vmem:[#allocation3 + $0x11] sm:$0x1] %v706_v3  ;;  %v672_v56 = vld [vmem:[%s893_s3 + $0x20] sm:$0xff]  ;;  %v671_v59 = vld [vmem:[%s893_s3 + $0x18] sm:$0xff] }
   0xb   :  { %v694_v13 = vpack.i.bf16 %v40_v12, %v39_v10  ;;  %223 = vst [vmem:[#allocation3 + $0x12] sm:$0x1] %v706_v3  ;;  %v43_v16 = vld [vmem:[#allocation2 + $0x2] sm:$0xff]  ;;  %v44_v17 = vld [vmem:[#allocation2 + $0xa] sm:$0xff]  ;;  %v41_v18 = vld [vmem:[#allocation2 + $0x13] sm:$0xff]  ;;  %442 = vmatpush.bf16.msra.mxu2 %v674_v32 }
   0xc   :  { %179 = vmatpush.bf16.msra.mxu0 %v661_v9  ;;  %224 = vst [vmem:[#allocation3 + $0x23] sm:$0x1] %v706_v3  ;;  %v42_v19 = vld [vmem:[#allocation2 + $0x1b] sm:$0xff]  ;;  %v68_v21 = vpack.c.bf16 %v44_v17, %v43_v16  ;;  %461 = vmatpush.bf16.msra.mxu3 %v682_v33  ;;  %v36_v37 = vld [vmem:[#allocation2 + $0x8] sm:$0xff]  ;;  %v670_v62 = vld [vmem:[%s893_s3 + $0x10] sm:$0xff] }
   0xd   :  { %695 = vrot.lane.b32.xlu0 %v694_v13, %s707_s14  ;;  %202 = vmatpush.bf16.msra.mxu1 %v665_v11  ;;  %v699_v22 = vpack.i.bf16 %v42_v19, %v41_v18  ;;  %v45_v26 = vld [vmem:[#allocation2 + $0x14] sm:$0xff]  ;;  %v35_v36 = vld [vmem:[#allocation2] sm:$0xff]  ;;  %v673_v53 = vld [vmem:[%s893_s3 + $0x28] sm:$0xff] }
   0xe   :  { %v37_v46 = vld [vmem:[#allocation2 + $0x12] sm:$0xff]  ;;  %v38_v47 = vld [vmem:[#allocation2 + $0x1a] sm:$0xff]  ;;  %v689_v54 = vld [vmem:[%s893_s3 + $0xa8] sm:$0xff] }
   0xf   :  { %v46_v27 = vld [vmem:[#allocation2 + $0x1c] sm:$0xff]  ;;  %443 = vmatpush.bf16.msra.mxu2 %v673_v53  ;;  %v677_v61 = vld [vmem:[%s893_s3 + $0x48] sm:$0xff]  ;;  %v686_v63 = vld [vmem:[%s893_s3 + $0x90] sm:$0xff] }
  0x10   :  { %180 = vmatpush.bf16.msra.mxu0 %v660_v14  ;;  %v70_v28 = vpack.c.bf16 %v46_v27, %v45_v26  ;;  %462 = vmatpush.bf16.msra.mxu3 %v681_v51  ;;  %v688_v57 = vld [vmem:[%s893_s3 + $0xa0] sm:$0xff]  ;;  %v687_v60 = vld [vmem:[%s893_s3 + $0x98] sm:$0xff]  ;;  %v669_v1 = vld [vmem:[%s893_s3 + $0x8] sm:$0xff] }
  0x11   :  { %203 = vmatpush.bf16.msra.mxu1 %v664_v15  ;;  %v676_v0 = vld [vmem:[%s893_s3 + $0x40] sm:$0xff]  ;;  %v685_v2 = vld [vmem:[%s893_s3 + $0x88] sm:$0xff] }
  0x12   :  { %v668_v3 = vld [vmem:[%s893_s3] sm:$0xff] }
  0x13   :  { %444 = vmatpush.bf16.msra.mxu2 %v672_v56  ;;  %v684_v4 = vld [vmem:[%s893_s3 + $0x80] sm:$0xff] }
  0x14   :  { %181 = vmatpush.bf16.msra.mxu0 %v659_v20  ;;  %558 = vmatmul.msk.bf16.vlgmr.msra.gmra.mxu1 %vm26_vm0, %v68_v21  ;;  %v704_v6 = vld [vmem:[%s892_s2] ss:$0 sm:$0xff] }
  0x15   :  { %700 = vrot.lane.b32.xlu0 %v699_v22, %s707_s14  ;;  %479 = vmatpush.bf16.msrb.mxu1 %v691_v31 }
  0x16   :  { %463 = vmatpush.bf16.msra.mxu3 %v680_v52 }
  0x17   :  { %445 = vmatpush.bf16.msra.mxu2 %v671_v59 }
  0x18   :  { %182 = vmatpush.bf16.msra.mxu0 %v658_v23 }
  0x19   :  { %480 = vmatpush.bf16.msrb.mxu1 %v690_v34 }
  0x1a   :  { %464 = vmatpush.bf16.msra.mxu3 %v679_v55 }
  0x1b   :  { %446 = vmatpush.bf16.msra.mxu2 %v670_v62 }
  0x1c   :  { %183 = vmatpush.bf16.msra.mxu0 %v657_v24 }
  0x1d   :  { %481 = vmatpush.bf16.msrb.mxu1 %v689_v54 }
  0x1e   :  { %465 = vmatpush.bf16.msra.mxu3 %v678_v58 }
  0x1f   :  { %447 = vmatpush.bf16.msra.mxu2 %v669_v1 }
  0x20   :  { %184 = vmatpush.bf16.msra.mxu0 %v656_v25 }
  0x21   :  { %482 = vmatpush.bf16.msrb.mxu1 %v688_v57 }
  0x22   :  { %466 = vmatpush.bf16.msra.mxu3 %v677_v61 }
  0x23   :  { %448 = vmatpush.bf16.msra.mxu2 %v668_v3 }
  0x24   :  { %559 = vmatmul.msk.bf16.gmra.mxu1 %vm26_vm0, %v70_v28 }
  0x25   :  { %483 = vmatpush.bf16.msrb.mxu1 %v687_v60 }
  0x26   :  { %467 = vmatpush.bf16.msra.mxu3 %v676_v0 }
  0x29   :  { %484 = vmatpush.bf16.msrb.mxu1 %v686_v63 }
  0x2d   :  { %485 = vmatpush.bf16.msrb.mxu1 %v685_v2 }
  0x31   :  { %486 = vmatpush.bf16.msrb.mxu1 %v684_v4 }
  0x7f   :  { %v696_v35 = vpop.permute.xlu0 %695 }
  0x80   :  { %v698_v38 = vunpack.i.h.bf16 %v696_v35  ;;  %v697_v39 = vunpack.i.l.bf16 %v696_v35 }
  0x82   :  { %v63_v40 = vsel %vm26_vm0, %v35_v36, %v697_v39  ;;  %v64_v41 = vsel %vm26_vm0, %v36_v37, %v698_v38 }
  0x83   :  { %v67_v42 = vpack.c.bf16 %v64_v41, %v63_v40  ;;  %v705_v41 = vld [vmem:[%s894_s4] ss:$0 sm:$0xff] }
  0x85   :  { %185 = vmatmul.bf16.vlgmr.msra.gmra.mxu0 %v67_v42 }
  0x87   :  { %v701_v43 = vpop.permute.xlu0 %700 }
  0x88   :  { %v703_v44 = vunpack.i.h.bf16 %v701_v43  ;;  %v702_v45 = vunpack.i.l.bf16 %v701_v43 }
  0x8a   :  { %v65_v48 = vsel %vm26_vm0, %v37_v46, %v702_v45  ;;  %v66_v49 = vsel %vm26_vm0, %v38_v47, %v703_v44 }
  0x8b   :  { %v69_v50 = vpack.c.bf16 %v66_v49, %v65_v48 }
  0x91   :  { %v205_v5 = vpop.f32.mrf.mxu1 }
  0x95   :  { %190 = vmatmul.bf16.gmra.mxu0 %v69_v50 }
  0x99   :  { %v207_v11 = vpop.f32.mrf.mxu1 }
  0xa1   :  { %v210_v17 = vpop.f32.mrf.mxu1 }
  0xa9   :  { %v212_v30 = vpop.f32.mrf.mxu1 }
 0x102   :  { %v186_v7 = vpop.f32.mrf.mxu0 }
 0x103   :  { %v187_v8 = vadd.f32 %v704_v6, %v186_v7 }
 0x105   :  { %v206_v9 = vadd.f32 %v205_v5, %v187_v8 }
 0x107   :  { %v215_v10 = vmax.f32 %v206_v9, 0.0 }
 0x109   :  { %221 = vst [vmem:[#allocation3 + $0x1] sm:$0xff] %v215_v10 }
 0x10a   :  { %v188_v12 = vpop.f32.mrf.mxu0 }
 0x10b   :  { %v189_v13 = vadd.f32 %v704_v6, %v188_v12 }
 0x10d   :  { %v208_v14 = vadd.f32 %v207_v11, %v189_v13 }
 0x10f   :  { %v216_v15 = vmax.f32 %v208_v14, 0.0 }
 0x110   :  { %v227_v22 = vld [vmem:[#allocation3] sm:$0xff] }
 0x111   :  { %222 = vst [vmem:[#allocation3 + $0x9] sm:$0xff] %v216_v15  ;;  %v240_v16 = vpack.c.bf16 %v216_v15, %v215_v10 }
 0x112   :  { %v191_v18 = vpop.f32.mrf.mxu0 }
 0x113   :  { %v192_v19 = vadd.f32 %v704_v6, %v191_v18  ;;  %468 = vmatmul.bf16.vlgmr.msra.gmra.mxu3 %v240_v16 }
 0x115   :  { %v211_v20 = vadd.f32 %v210_v17, %v192_v19 }
 0x117   :  { %v217_v21 = vmax.f32 %v211_v20, 0.0 }
 0x118   :  { %v228_v23 = vld [vmem:[#allocation3 + $0x8] sm:$0xff] }
 0x119   :  { %v235_v24 = vld [vmem:[#allocation3 + $0x2] sm:$0xff]  ;;  %v236_v25 = vld [vmem:[#allocation3 + $0xa] sm:$0xff]  ;;  %225 = vst [vmem:[#allocation3 + $0x13] sm:$0xff] %v217_v21  ;;  %v239_v26 = vpack.c.bf16 %v228_v23, %v227_v22 }
 0x11a   :  { %v241_v27 = vpack.c.bf16 %v236_v25, %v235_v24  ;;  %v193_v28 = vpop.f32.mrf.mxu0 }
 0x11b   :  { %v194_v29 = vadd.f32 %v704_v6, %v193_v28  ;;  %449 = vmatmul.bf16.vlgmr.msra.gmra.mxu2 %v239_v26 }
 0x11c   :  { %487 = vmatmul.bf16.vlgmr.msrb.gmra.mxu1 %v241_v27 }
 0x11d   :  { %v213_v31 = vadd.f32 %v212_v30, %v194_v29 }
 0x11f   :  { %v218_v32 = vmax.f32 %v213_v31, 0.0 }
 0x120   :  { %v229_v34 = vld [vmem:[#allocation3 + $0x12] sm:$0xff] }
 0x121   :  { %226 = vst [vmem:[#allocation3 + $0x1b] sm:$0xff] %v218_v32  ;;  %v243_v33 = vpack.c.bf16 %v218_v32, %v217_v21 }
 0x123   :  { %473 = vmatmul.bf16.gmra.mxu3 %v243_v33 }
 0x128   :  { %v230_v35 = vld [vmem:[#allocation3 + $0x1a] sm:$0xff] }
 0x129   :  { %v237_v36 = vld [vmem:[#allocation3 + $0x14] sm:$0xff]  ;;  %v238_v37 = vld [vmem:[#allocation3 + $0x1c] sm:$0xff]  ;;  %v242_v38 = vpack.c.bf16 %v230_v35, %v229_v34 }
 0x12a   :  { %v244_v39 = vpack.c.bf16 %v238_v37, %v237_v36 }
 0x12b   :  { %454 = vmatmul.bf16.gmra.mxu2 %v242_v38 }
 0x12c   :  { %492 = vmatmul.bf16.gmra.mxu1 %v244_v39 }
 0x196   :  { %v469_v40 = vpop.f32.mrf.mxu3 }
 0x199   :  { %v488_v42 = vpop.f32.mrf.mxu1 }
 0x19e   :  { %v450_v43 = vpop.f32.mrf.mxu2  ;;  %v471_v47 = vpop.f32.mrf.mxu3 }
 0x19f   :  { %v451_v44 = vadd.f32 %v705_v41, %v450_v43 }
 0x1a1   :  { %v470_v45 = vadd.f32 %v469_v40, %v451_v44  ;;  %v490_v49 = vpop.f32.mrf.mxu1 }
 0x1a3   :  { %v489_v46 = vadd.f32 %v488_v42, %v470_v45 }
 0x1a5   :  { %v498_v48 = vmax.f32 %v489_v46, 0.0 }
 0x1a6   :  { %v452_v50 = vpop.f32.mrf.mxu2  ;;  %v474_v56 = vpop.f32.mrf.mxu3 }
 0x1a7   :  { %502 = vst [vmem:[%s895_s5] sm:$0xff] %v498_v48  ;;  %v453_v51 = vadd.f32 %v705_v41, %v452_v50 }
 0x1a9   :  { %v472_v52 = vadd.f32 %v471_v47, %v453_v51  ;;  %v493_v58 = vpop.f32.mrf.mxu1 }
 0x1ab   :  { %v491_v53 = vadd.f32 %v490_v49, %v472_v52 }
 0x1ad   :  { %v499_v54 = vmax.f32 %v491_v53, 0.0 }
 0x1ae   :  { %v455_v55 = vpop.f32.mrf.mxu2  ;;  %v476_v0 = vpop.f32.mrf.mxu3 }
 0x1af   :  { %503 = vst [vmem:[%s895_s5 + $0x8] sm:$0xff] %v499_v54  ;;  %v456_v57 = vadd.f32 %v705_v41, %v455_v55 }
 0x1b1   :  { %v475_v59 = vadd.f32 %v474_v56, %v456_v57  ;;  %v495_v2 = vpop.f32.mrf.mxu1 }
 0x1b3   :  { %v494_v60 = vadd.f32 %v493_v58, %v475_v59 }
 0x1b5   :  { %v500_v61 = vmax.f32 %v494_v60, 0.0 }
 0x1b6   :  { %v457_v62 = vpop.f32.mrf.mxu2 }
 0x1b7   :  { %504 = vst [vmem:[%s895_s5 + $0x10] sm:$0xff] %v500_v61  ;;  %v458_v63 = vadd.f32 %v705_v41, %v457_v62 }
 0x1b9   :  { %v477_v1 = vadd.f32 %v476_v0, %v458_v63 }
 0x1bb   :  { %v496_v3 = vadd.f32 %v495_v2, %v477_v1 }
 0x1bd   :  { %v501_v4 = vmax.f32 %v496_v3, 0.0 }
 0x1bf   :  { %505 = vst [vmem:[%s895_s5 + $0x18] sm:$0xff] %v501_v4 }

</bundles_post_ra>
